<compile_context>
chip_gen: v7x
topology: tpu7x:2x2x1
jax: 0.10.0
libtpu: 0.0.40
codegen_flags: <defaults>
</compile_context>

<pallas_src>
import jax
import jax.numpy as jnp
import numpy as np
from jax.experimental import pallas as pl
from jax.experimental.pallas import tpu as pltpu

C_OUT = 2                          # conv output channels
K = 5                              # conv kernel size
PAD = K // 2                       # 2
H = W = 8                          # input spatial size (implied by Linear(32,4))
POOL_H = POOL_W = H // 2           # 4
FEAT = C_OUT * POOL_H * POOL_W     # 32   (torch flatten width)
CONV_FEAT = C_OUT * H * W          # 128  (flattened conv/relu feature width)
N_CLASSES = 4
BLOCK_B = 4096                     # samples per grid step (batch on the sublane axis)


def _testnet_kernel(x_ref, wconv_ref, bconv_ref, wfc_ref, bfc_ref, out_ref):
    # x_ref:     (B, 64)    flattened 8x8 inputs, batch on sublanes
    # wconv_ref: (64, 128)  banded conv weight: input pixel -> (co, oh, ow) outputs
    # bconv_ref: (1, 128)   conv bias broadcast over output pixels
    # wfc_ref:   (128, 4)   classifier weight scattered onto the 128 un-compacted lanes
    # bfc_ref:   (1, 4)     classifier bias
    # out_ref:   (B, 4)     logits
    # Conv2d(1,2,5,padding=2) as one MXU matmul, then bias + ReLU on the VPU.
    conv = jnp.dot(x_ref[...], wconv_ref[...], preferred_element_type=jnp.float32)
    r = jnp.maximum(conv + bconv_ref[...], 0.0)                       # (B, 128)
    # MaxPool2d(2,2) via two XLU lane rotations (jnp.roll semantics):
    #   roll(shift=127)[:, f] == r[:, (f+1) % 128]  -> max over the ow pair
    #   roll(shift=120)[:, f] == hp[:, (f+8) % 128] -> max over the oh pair
    # Pooled values land on lanes co*64 + 16*i + 2*j; all other lanes (and the
    # wrap-around lanes) hold finite junk that wfc_ref zeros out.
    hp = jnp.maximum(r, pltpu.roll(r, shift=127, axis=1))
    m = jnp.maximum(hp, pltpu.roll(hp, shift=120, axis=1))
    # Flatten + Linear(32,4) as one batched MXU matmul.
    z = jnp.dot(m, wfc_ref[...], preferred_element_type=jnp.float32)
    out_ref[...] = (z + bfc_ref[...]).astype(out_ref.dtype)


def _prepare_params(wconv, bconv, wfc, bfc):
    """Host/trace-time repacking of the PyTorch parameters for the kernel."""
    # Banded conv matrix: wmat_t[ih*8+iw, co*64+oh*8+ow] = wconv[co,0,kh,kw] with
    # kh = ih-oh+2, kw = iw-ow+2 whenever the tap lands inside the 8x8 input
    # (out-of-range taps correspond to the zero padding and are simply omitted).
    rows, cols, srcs = [], [], []
    for co in range(C_OUT):
        for oh in range(H):
            for ow in range(W):
                for kh in range(K):
                    for kw in range(K):
                        ih, iw = oh + kh - PAD, ow + kw - PAD
                        if 0 <= ih < H and 0 <= iw < W:
                            rows.append(ih * W + iw)
                            cols.append(co * H * W + oh * W + ow)
                            srcs.append(co * K * K + kh * K + kw)
    rows, cols, srcs = map(np.asarray, (rows, cols, srcs))
    wc_flat = wconv.astype(jnp.float32).reshape(-1)
    wmat_t = (jnp.zeros((H * W, CONV_FEAT), jnp.float32)
              .at[rows, cols].set(wc_flat[srcs]))

    bconv_row = jnp.repeat(bconv.astype(jnp.float32), H * W).reshape(1, CONV_FEAT)

    # Scatter the (4, 32) fc weight onto the 128 un-compacted feature lanes:
    # torch feature t = co*16 + i*4 + j lives on lane co*64 + 16*i + 2*j.
    t = np.arange(FEAT)
    tco = t // (POOL_H * POOL_W)
    ti = (t // POOL_W) % POOL_H
    tj = t % POOL_W
    fcols = tco * (H * W) + (2 * ti) * W + 2 * tj
    wfc_scat_t = (jnp.zeros((CONV_FEAT, N_CLASSES), jnp.float32)
                  .at[fcols, :].set(wfc.astype(jnp.float32).T))

    bfc_row = bfc.astype(jnp.float32).reshape(1, N_CLASSES)
    return wmat_t, bconv_row, wfc_scat_t, bfc_row


def testnet_forward(x, wconv, bconv, wfc, bfc, block_b=BLOCK_B):
    """x: (N, 1, 8, 8) float32 (NCHW, like PyTorch). Returns (N, 4) float32."""
    n = x.shape[0]
    # Cap the block for small batches (keep it sublane-aligned); pad batch to a
    # block multiple.  Large batches keep multiple grid steps (megacore parallel).
    block_b = int(min(block_b, max(8, pl.cdiv(n, 8) * 8)))
    n_pad = int(pl.cdiv(n, block_b) * block_b)

    # Free reshape: (N,1,8,8) -> (N, 64).  No HBM transpose on input or output.
    xf = x.reshape(n, H * W).astype(jnp.float32)
    if n_pad != n:
        xf = jnp.pad(xf, ((0, n_pad - n), (0, 0)))

    wmat_t, bconv_row, wfc_scat_t, bfc_row = _prepare_params(wconv, bconv, wfc, bfc)

    out = pl.pallas_call(
        _testnet_kernel,
        out_shape=jax.ShapeDtypeStruct((n_pad, N_CLASSES), jnp.float32),
        grid=(n_pad // block_b,),
        in_specs=[
            pl.BlockSpec((block_b, H * W), lambda i: (i, 0)),         # batched inputs
            pl.BlockSpec((H * W, CONV_FEAT), lambda i: (0, 0)),       # banded conv weight
            pl.BlockSpec((1, CONV_FEAT), lambda i: (0, 0)),           # conv bias row
            pl.BlockSpec((CONV_FEAT, N_CLASSES), lambda i: (0, 0)),   # scattered fc weight
            pl.BlockSpec((1, N_CLASSES), lambda i: (0, 0)),           # fc bias row
        ],
        out_specs=pl.BlockSpec((block_b, N_CLASSES), lambda i: (i, 0)),
        compiler_params=pltpu.CompilerParams(
            dimension_semantics=("parallel",),
            vmem_limit_bytes=32 * 1024 * 1024),
    )(xf, wmat_t, bconv_row, wfc_scat_t, bfc_row)

    return out[:n]


def reference_forward(x, wconv, bconv, wfc, bfc):
    """Pure-JAX reference of the PyTorch forward (NCHW)."""
    conv = jax.lax.conv_general_dilated(
        x, wconv, window_strides=(1, 1), padding=((2, 2), (2, 2)),
        dimension_numbers=("NCHW", "OIHW", "NCHW"))
    conv = conv + bconv.reshape(1, C_OUT, 1, 1)
    r = jnp.maximum(conv, 0.0)
    n = x.shape[0]
    p = r.reshape(n, C_OUT, POOL_H, 2, POOL_W, 2).max(axis=(3, 5))
    flat = p.reshape(n, FEAT)
    return flat @ wfc.T + bfc


if __name__ == "__main__":
    key = jax.random.PRNGKey(0)
    kx, kw1, kb1, kw2, kb2 = jax.random.split(key, 5)

    batch = 2
    x = jax.random.normal(kx, (batch, 1, H, W), dtype=jnp.float32)

    # Deterministic synthetic parameters (shapes from the module's __init__)
    wconv = jax.random.normal(kw1, (C_OUT, 1, K, K), dtype=jnp.float32) * 0.2
    bconv = jax.random.normal(kb1, (C_OUT,), dtype=jnp.float32) * 0.1
    wfc = jax.random.normal(kw2, (N_CLASSES, FEAT), dtype=jnp.float32) * 0.2
    bfc = jax.random.normal(kb2, (N_CLASSES,), dtype=jnp.float32) * 0.1

    z = testnet_forward(x, wconv, bconv, wfc, bfc)
    jax.block_until_ready(z)

    z_ref = reference_forward(x, wconv, bconv, wfc, bfc)
    assert z.shape == (batch, N_CLASSES)
    np.testing.assert_allclose(np.asarray(z), np.asarray(z_ref), rtol=1e-4, atol=1e-4)
    print("KERNEL_OK")
</pallas_src>

<mosaic_0001>
module attributes {stable_mosaic.version = 11 : i64} {
  func.func @_testnet_kernel(%arg0: i32, %arg1: memref<8x64xf32, #tpu.memory_space<vmem>>, %arg2: memref<64x128xf32, #tpu.memory_space<vmem>>, %arg3: memref<1x128xf32, #tpu.memory_space<vmem>>, %arg4: memref<128x4xf32, #tpu.memory_space<vmem>>, %arg5: memref<1x4xf32, #tpu.memory_space<vmem>>, %arg6: memref<8x4xf32, #tpu.memory_space<vmem>>) attributes {dimension_semantics = [#tpu.dimension_semantics<parallel>], iteration_bounds = array<i64: 1>, scalar_prefetch = 0 : i64, scratch_operands = 0 : i64, tpu.core_type = #tpu.core_type<tc>, window_params = [{transform_indices = @transform_0, window_bounds = array<i64: 8, 64>}, {pipeline_mode = #tpu.pipeline_mode<synchronous>, transform_indices = @transform_1, window_bounds = array<i64: 64, 128>}, {pipeline_mode = #tpu.pipeline_mode<synchronous>, transform_indices = @transform_2, window_bounds = array<i64: 1, 128>}, {pipeline_mode = #tpu.pipeline_mode<synchronous>, transform_indices = @transform_3, window_bounds = array<i64: 128, 4>}, {pipeline_mode = #tpu.pipeline_mode<synchronous>, transform_indices = @transform_4, window_bounds = array<i64: 1, 4>}, {transform_indices = @transform_5, window_bounds = array<i64: 8, 4>}]} {
    %c0 = arith.constant 0 : index
    %c0_0 = arith.constant 0 : index
    %0 = vector.load %arg1[%c0, %c0_0] : memref<8x64xf32, #tpu.memory_space<vmem>>, vector<8x64xf32>
    %c0_1 = arith.constant 0 : index
    %c0_2 = arith.constant 0 : index
    %1 = vector.load %arg2[%c0_1, %c0_2] : memref<64x128xf32, #tpu.memory_space<vmem>>, vector<64x128xf32>
    %cst = arith.constant dense<0.000000e+00> : vector<8x128xf32>
    %2 = tpu.matmul %0, %1, %cst {dimension_numbers = #tpu.dot_dimension_numbers<[1], [0], [0], [1], [0, 0, 1, 1], [], []>} : vector<8x64xf32>, vector<64x128xf32>, vector<8x128xf32> -> vector<8x128xf32>
    %c0_3 = arith.constant 0 : index
    %c0_4 = arith.constant 0 : index
    %3 = vector.load %arg3[%c0_3, %c0_4] : memref<1x128xf32, #tpu.memory_space<vmem>>, vector<1x128xf32>
    %4 = vector.broadcast %3 : vector<1x128xf32> to vector<8x128xf32>
    %5 = arith.addf %2, %4 : vector<8x128xf32>
    %cst_5 = arith.constant 0.000000e+00 : f32
    %6 = vector.broadcast %cst_5 : f32 to vector<8x128xf32>
    %7 = arith.maximumf %5, %6 : vector<8x128xf32>
    %c127_i32 = arith.constant 127 : i32
    %8 = tpu.dynamic_rotate %7 by %c127_i32 dim 1 : vector<8x128xf32>, i32 -> vector<8x128xf32>
    %9 = arith.maximumf %7, %8 : vector<8x128xf32>
    %c120_i32 = arith.constant 120 : i32
    %10 = tpu.dynamic_rotate %9 by %c120_i32 dim 1 : vector<8x128xf32>, i32 -> vector<8x128xf32>
    %11 = arith.maximumf %9, %10 : vector<8x128xf32>
    %c0_6 = arith.constant 0 : index
    %c0_7 = arith.constant 0 : index
    %12 = vector.load %arg4[%c0_6, %c0_7] : memref<128x4xf32, #tpu.memory_space<vmem>>, vector<128x4xf32>
    %cst_8 = arith.constant dense<0.000000e+00> : vector<8x4xf32>
    %13 = tpu.matmul %11, %12, %cst_8 {dimension_numbers = #tpu.dot_dimension_numbers<[1], [0], [0], [1], [0, 0, 1, 1], [], []>} : vector<8x128xf32>, vector<128x4xf32>, vector<8x4xf32> -> vector<8x4xf32>
    %c0_9 = arith.constant 0 : index
    %c0_10 = arith.constant 0 : index
    %14 = vector.load %arg5[%c0_9, %c0_10] : memref<1x4xf32, #tpu.memory_space<vmem>>, vector<1x4xf32>
    %15 = vector.broadcast %14 : vector<1x4xf32> to vector<8x4xf32>
    %16 = arith.addf %13, %15 : vector<8x4xf32>
    %c0_11 = arith.constant 0 : index
    %c0_12 = arith.constant 0 : index
    %17 = vector.load %arg6[%c0_11, %c0_12] : memref<8x4xf32, #tpu.memory_space<vmem>>, vector<8x4xf32>
    tpu.vector_store %arg6[%c0_11, %c0_12], %16 {strides = array<i32>} : memref<8x4xf32, #tpu.memory_space<vmem>>, vector<8x4xf32>,
    return
  }
  func.func @transform_0(%arg0: i32) -> (i32, i32) {
    %c0_i32 = arith.constant 0 : i32
    %c0_i32_0 = arith.constant 0 : i32
    return %arg0, %c0_i32 : i32, i32
  }
  func.func @transform_1(%arg0: i32) -> (i32, i32) {
    %c0_i32 = arith.constant 0 : i32
    %c0_i32_0 = arith.constant 0 : i32
    %c0_i32_1 = arith.constant 0 : i32
    return %c0_i32, %c0_i32_0 : i32, i32
  }
  func.func @transform_2(%arg0: i32) -> (i32, i32) {
    %c0_i32 = arith.constant 0 : i32
    %c0_i32_0 = arith.constant 0 : i32
    %c0_i32_1 = arith.constant 0 : i32
    return %c0_i32, %c0_i32_0 : i32, i32
  }
  func.func @transform_3(%arg0: i32) -> (i32, i32) {
    %c0_i32 = arith.constant 0 : i32
    %c0_i32_0 = arith.constant 0 : i32
    %c0_i32_1 = arith.constant 0 : i32
    return %c0_i32, %c0_i32_0 : i32, i32
  }
  func.func @transform_4(%arg0: i32) -> (i32, i32) {
    %c0_i32 = arith.constant 0 : i32
    %c0_i32_0 = arith.constant 0 : i32
    %c0_i32_1 = arith.constant 0 : i32
    return %c0_i32, %c0_i32_0 : i32, i32
  }
  func.func @transform_5(%arg0: i32) -> (i32, i32) {
    %c0_i32 = arith.constant 0 : i32
    %c0_i32_0 = arith.constant 0 : i32
    return %arg0, %c0_i32 : i32, i32
  }
}

</mosaic_0001>

<bundles_post_ra>
// kernel: tpu_custom_call.1
= control target key start
LH: loop header
LB: loop body
LE: loop exit
PB: predicated region body
PF: predicated region fallthrough
CT: control target
= control target key end

     0   :  { %v340_v0 = vmov 0.0|0.0   ;;  %vm341_vm0 = vmmov 0   ;;  %v342_v4 = vmov 0.0   ;;  %vm36_vm1 = vcmask 523264   ;;  %s343_s26 = smov 127   ;;  %s344_s17 = smov 120   ;;  %s471_s1 = inlined_call_operand.vmem [shape: f32[64,128], index: 1, kind: input, shape index: {}]   ;;  %s472_s0 = inlined_call_operand.vmem [shape: f32[8,64], index: 0, kind: input, shape index: {}]   ;;  %s473_s3 = inlined_call_operand.vmem [shape: f32[128,4], index: 3, kind: input, shape index: {}]   ;;  %s474_s2 = inlined_call_operand.vmem [shape: f32[1,128], index: 2, kind: input, shape index: {}]   ;;  %s475_s4 = inlined_call_operand.vmem [shape: f32[1,4], index: 4, kind: input, shape index: {}]   ;;  %s476_s5 = inlined_call_operand.vmem [shape: f32[8,4], index: 5, kind: output, shape index: {}]  }
   0x1   :  { %299 = vmatprep.subr.bf16.mxu0 %v340_v0  ;;  %v21_v1 = vld [vmem:[%s471_s1] sm:$0xff]  ;;  %v22_v2 = vld [vmem:[%s471_s1 + $0x8] sm:$0xff]  ;;  %v23_v3 = vld [vmem:[%s471_s1 + $0x10] sm:$0xff]  ;;  %261 = vmatprep.mubr.msk.f32.mxu0 %vm341_vm0, %v342_v4  ;;  %vm210_vm2 = vcmask 31744  }
   0x2   :  { %v300_v5 = vpack.c.bf16 %v22_v2, %v21_v1  ;;  %v24_v6 = vld [vmem:[%s471_s1 + $0x18] sm:$0xff]  ;;  %311 = vmatprep.subr.bf16.mxu1 %v340_v0  ;;  %296 = vmatprep.mubr.msk.f32.mxu1 %vm341_vm0, %v342_v4  ;;  %v25_v8 = vld [vmem:[%s471_s1 + $0x20] sm:$0xff]  ;;  %v26_v9 = vld [vmem:[%s471_s1 + $0x28] sm:$0xff] }
   0x3   :  { %v303_v7 = vpack.c.bf16 %v24_v6, %v23_v3  ;;  %v306_v10 = vpack.c.bf16 %v26_v9, %v25_v8  ;;  %v27_v11 = vld [vmem:[%s471_s1 + $0x30] sm:$0xff]  ;;  %v28_v12 = vld [vmem:[%s471_s1 + $0x38] sm:$0xff]  ;;  %v20_v14 = vld [vmem:[%s472_s0] sm:$0xff] }
   0x4   :  { %301 = vmatpush3.bf16.msra.mxu0 %v300_v5  ;;  %v309_v13 = vpack.c.bf16 %v28_v12, %v27_v11  ;;  %v117_v15 = vld [vmem:[%s473_s3] sm:$0xff]  ;;  %v118_v16 = vld [vmem:[%s473_s3 + $0x8] sm:$0xff]  ;;  %v119_v17 = vld [vmem:[%s473_s3 + $0x10] sm:$0xff] }
   0x5   :  { %302 = vmatprep.subr.bf16.mxu0 %v340_v0  ;;  %v312_v18 = vpack.c.bf16 %v118_v16, %v117_v15  ;;  %v120_v19 = vld [vmem:[%s473_s3 + $0x18] sm:$0xff]  ;;  %v216_v20 = vld [vmem:[%s474_s2] ss:$0 sm:$0xff]  ;;  %v122_v23 = vld [vmem:[%s473_s3 + $0x28] sm:$0xff] }
   0x6   :  { %v315_v21 = vpack.c.bf16 %v120_v19, %v119_v17  ;;  %v121_v22 = vld [vmem:[%s473_s3 + $0x20] sm:$0xff]  ;;  %v123_v29 = vld [vmem:[%s473_s3 + $0x30] sm:$0xff]  ;;  %v124_v30 = vld [vmem:[%s473_s3 + $0x38] sm:$0xff] }
   0x7   :  { %313 = vmatpush3.bf16.msra.mxu1 %v312_v18  ;;  %v318_v27 = vpack.c.bf16 %v122_v23, %v121_v22  ;;  %v321_v31 = vpack.c.bf16 %v124_v30, %v123_v29  ;;  %v125_v32 = vld [vmem:[%s473_s3 + $0x40] sm:$0xff]  ;;  %v126_v33 = vld [vmem:[%s473_s3 + $0x48] sm:$0xff]  ;;  %v127_v35 = vld [vmem:[%s473_s3 + $0x50] sm:$0xff] }
   0x8   :  { %304 = vmatpush3.bf16.msra.mxu0 %v303_v7  ;;  %314 = vmatprep.subr.bf16.mxu1 %v340_v0  ;;  %v324_v34 = vpack.c.bf16 %v126_v33, %v125_v32  ;;  %v128_v36 = vld [vmem:[%s473_s3 + $0x58] sm:$0xff]  ;;  %v129_v38 = vld [vmem:[%s473_s3 + $0x60] sm:$0xff]  ;;  %v130_v39 = vld [vmem:[%s473_s3 + $0x68] sm:$0xff] }
   0x9   :  { %305 = vmatprep.subr.bf16.mxu0 %v340_v0  ;;  %v327_v37 = vpack.c.bf16 %v128_v36, %v127_v35  ;;  %v330_v40 = vpack.c.bf16 %v130_v39, %v129_v38  ;;  %v131_v41 = vld [vmem:[%s473_s3 + $0x70] sm:$0xff]  ;;  %v132_v42 = vld [vmem:[%s473_s3 + $0x78] sm:$0xff]  ;;  %v218_v48 = vld [vmem:[%s475_s4] ss:$0 sm:$0xff] }
   0xa   :  { %v333_v43 = vpack.c.bf16 %v132_v42, %v131_v41 }
   0xb   :  { %316 = vmatpush3.bf16.msra.mxu1 %v315_v21 }
   0xc   :  { %307 = vmatpush3.bf16.msra.mxu0 %v306_v10  ;;  %317 = vmatprep.subr.bf16.mxu1 %v340_v0 }
   0xd   :  { %308 = vmatprep.subr.bf16.mxu0 %v340_v0 }
   0xf   :  { %319 = vmatpush3.bf16.msra.mxu1 %v318_v27 }
  0x10   :  { %310 = vmatpush3.bf16.msra.mxu0 %v309_v13  ;;  %320 = vmatprep.subr.bf16.mxu1 %v340_v0 }
  0x13   :  { %262 = vmatmul.mubr.msk.f32.vlgmr.msra.gmra.mrb[0].mxu0 %vm36_vm1, %v20_v14  ;;  %322 = vmatpush3.bf16.msra.mxu1 %v321_v31 }
  0x14   :  { %323 = vmatprep.subr.bf16.mxu1 %v340_v0 }
  0x17   :  { %325 = vmatpush3.bf16.msra.mxu1 %v324_v34 }
  0x18   :  { %326 = vmatprep.subr.bf16.mxu1 %v340_v0 }
  0x1b   :  { %328 = vmatpush3.bf16.msra.mxu1 %v327_v37 }
  0x1c   :  { %329 = vmatprep.subr.bf16.mxu1 %v340_v0 }
  0x1f   :  { %331 = vmatpush3.bf16.msra.mxu1 %v330_v40 }
  0x20   :  { %332 = vmatprep.subr.bf16.mxu1 %v340_v0 }
  0x23   :  { %334 = vmatpush3.bf16.msra.mxu1 %v333_v43 }
  0xe6   :  { %v106_v24 = vpop.f32.mrb[0].mxu0 }
  0xe7   :  { %v107_v25 = vadd.f32 %v216_v20, %v106_v24  ;;  %v263_v26 = vpop.f32.mrb[1].mxu0 }
  0xe9   :  { %v110_v28 = vmax.f32 %v107_v25, 0.0 }
  0xeb   :  { %111 = vrot.lane.b32.xlu0 %v110_v28, %s343_s26 }
 0x15d   :  { %v112_v44 = vpop.permute.xlu0 %111 }
 0x15e   :  { %v113_v45 = vmax.f32 %v110_v28, %v112_v44 }
 0x160   :  { %114 = vrot.lane.b32.xlu0 %v113_v45, %s344_s17 }
 0x1d2   :  { %v115_v46 = vpop.permute.xlu0 %114 }
 0x1d3   :  { %v116_v47 = vmax.f32 %v113_v45, %v115_v46 }
 0x1d5   :  { %297 = vmatmul.mubr.f32.vlgmr.msra.gmra.mrb[0].mxu1 %v116_v47 }
 0x2a8   :  { %v206_v49 = vpop.f32.mrb[0].mxu1 }
 0x2a9   :  { %v207_v50 = vadd.f32 %v218_v48, %v206_v49  ;;  %v298_v51 = vpop.f32.mrb[1].mxu1 }
 0x2ab   :  { %211 = vst.msk [vmem:[%s476_s5] sm:$0xff] %vm210_vm2, %v207_v50 }

</bundles_post_ra>
